<compile_context>
chip_gen: v7x
topology: tpu7x:2x2x1
jax: 0.10.0
libtpu: 0.0.40
codegen_flags: <defaults>
</compile_context>

<pallas_src>
import math
from functools import partial

import jax
import jax.numpy as jnp
from jax.experimental import pallas as pl
from jax.experimental.pallas import tpu as pltpu

# ---------------------------------------------------------------------------
# Model hyper-parameters (defaults of the PyTorch module, small shapes)
# ---------------------------------------------------------------------------
NUM_COMPONENTS = 4
OBS_DIM = 16
ACT_DIM = 4
HIDDEN = 64            # cmp_hidden_dims / cmp_cov_hidden_dims
INIT_STD = 1.0         # cmp_init_std
MINIMAL_STD = 1e-5     # cmp_minimal_std
OUT_DIM = NUM_COMPONENTS * ACT_DIM       # 16  (per-head output width)
FUSED_OUT = 2 * OUT_DIM                  # 32  (means | std-pre)
FUSED_HID = 2 * HIDDEN                   # 128 (mean hidden | std hidden)
OUT_PAD = 128                            # lane-dense output slab width

# softplus_inverse(init_std): shift so the std head initially outputs ~init_std
_INIT_SHIFT = math.log(math.expm1(INIT_STD))

TM_MAX = 4096      # max rows per grid step (~4.5 MiB/step double-buffered)
ROW_ALIGN = 16     # bf16 sublane packing -> keep row tiles multiples of 16


def _round_up(x, m):
    return (x + m - 1) // m * m


def _tpu_kind():
    try:
        d = jax.devices()[0]
        if d.platform != "tpu":
            return ""
        return d.device_kind.lower()
    except Exception:
        return ""


_KIND = _tpu_kind()
# bf16 VPU/EUP path exists on v6e/v7x; v5e and older keep elementwise math in f32.
_BF16_ACT = any(t in _KIND for t in ("v6", "v7", "tpu7"))
_ACT_DTYPE = jnp.bfloat16 if _BF16_ACT else jnp.float32
# v7x has 2 TensorCores per chip: make sure the "parallel" grid has >=2 steps.
_MIN_GRID_STEPS = 2 if ("v7" in _KIND or "tpu7" in _KIND) else 1


# ---------------------------------------------------------------------------
# Pallas kernel: fused (mean-head || std-head) MLP, 3 matmuls total
# ---------------------------------------------------------------------------
def _gmm_fused_kernel(x_ref,
                      w1_ref, b1_ref, w2_ref, b2_ref, wo_ref, bo_ref,
                      out_ref, *, act_dtype):
    # x already bf16 (cast in wrapper); weights bf16; f32 MXU accumulation.
    x = x_ref[...]

    # layer 1: (TM, 16) @ (16, 128) -> [mean hidden | std hidden]
    h = jnp.dot(x, w1_ref[...], preferred_element_type=jnp.float32) + b1_ref[...]
    h = jnp.tanh(h.astype(act_dtype)).astype(jnp.bfloat16)

    # layer 2: block-diag (128, 128) keeps the two heads independent
    h = jnp.dot(h, w2_ref[...], preferred_element_type=jnp.float32) + b2_ref[...]
    h = jnp.tanh(h.astype(act_dtype)).astype(jnp.bfloat16)

    # output layer: block-diag, zero-padded to 128 lanes -> lane-dense slab
    pre = jnp.dot(h, wo_ref[...], preferred_element_type=jnp.float32) + bo_ref[...]

    # lanes [0,16): means | [16,32): std pre-activations | [32,128): zeros
    std = jax.nn.softplus(pre[:, OUT_DIM:FUSED_OUT] + _INIT_SHIFT) + MINIMAL_STD

    out_ref[...] = pre                        # full-width unmasked store
    out_ref[:, OUT_DIM:FUSED_OUT] = std       # overwrite the 16 std lanes


def _choose_tile(n):
    """Balanced row tiling: tiles <= TM_MAX, >= _MIN_GRID_STEPS steps, 16-aligned."""
    n_align = _round_up(max(n, 1), ROW_ALIGN)
    steps = max(pl.cdiv(n_align, TM_MAX), _MIN_GRID_STEPS)
    steps = max(min(steps, n_align // ROW_ALIGN), 1)
    tm = _round_up(pl.cdiv(n_align, steps), ROW_ALIGN)
    n_pad = _round_up(n_align, tm)
    return tm, n_pad


def _run_gmm_mlp(x_flat, fused_params):
    """x_flat: (N, OBS_DIM) f32. Returns (means, stds), each (N, OUT_DIM) f32."""
    n = x_flat.shape[0]
    w1, b1, w2, b2, wo, bo = fused_params

    tm, n_pad = _choose_tile(n)

    # bf16 input: halves HBM->VMEM bytes; it only feeds the bf16 MXU matmul.
    x_flat = x_flat.astype(jnp.bfloat16)
    if n_pad != n:
        x_flat = jnp.pad(x_flat, ((0, n_pad - n), (0, 0)))

    def full(arr):
        nd = arr.ndim
        return pl.BlockSpec(arr.shape, lambda i, _nd=nd: (0,) * _nd)

    grid_spec = pltpu.PrefetchScalarGridSpec(
        num_scalar_prefetch=0,
        grid=(n_pad // tm,),
        in_specs=[
            pl.BlockSpec((tm, OBS_DIM), lambda i: (i, 0)),
            full(w1), full(b1), full(w2), full(b2), full(wo), full(bo),
        ],
        out_specs=pl.BlockSpec((tm, OUT_PAD), lambda i: (i, 0)),
    )

    out = pl.pallas_call(
        partial(_gmm_fused_kernel, act_dtype=_ACT_DTYPE),
        grid_spec=grid_spec,
        out_shape=jax.ShapeDtypeStruct((n_pad, OUT_PAD), jnp.float32),
        compiler_params=pltpu.CompilerParams(
            dimension_semantics=("parallel",)),   # megacore sharding on v7x
    )(x_flat, w1, b1, w2, b2, wo, bo)

    out = out[:n]
    return out[:, :OUT_DIM], out[:, OUT_DIM:FUSED_OUT]


# ---------------------------------------------------------------------------
# Weight fusion: 12 per-head params -> 6 fused params (done once, outside)
# ---------------------------------------------------------------------------
def fuse_params(params):
    (w1m, b1m, w2m, b2m, wom, bom,
     w1s, b1s, w2s, b2s, wos, bos) = params

    zH = jnp.zeros((HIDDEN, HIDDEN), jnp.float32)
    zO = jnp.zeros((HIDDEN, OUT_DIM), jnp.float32)

    w1 = jnp.concatenate([w1m, w1s], axis=1)          # (OBS_DIM, 128)
    b1 = jnp.concatenate([b1m, b1s], axis=1)          # (1, 128)
    w2 = jnp.block([[w2m, zH], [zH, w2s]])            # (128, 128) block-diag
    b2 = jnp.concatenate([b2m, b2s], axis=1)          # (1, 128)
    wo = jnp.block([[wom, zO], [zO, wos]])            # (128, 32) block-diag
    bo = jnp.concatenate([bom, bos], axis=1)          # (1, 32)

    # Zero-pad the output layer to 128 lanes -> lane-dense output slab.
    wo = jnp.pad(wo, ((0, 0), (0, OUT_PAD - FUSED_OUT)))
    bo = jnp.pad(bo, ((0, 0), (0, OUT_PAD - FUSED_OUT)))

    # Weights in bf16 for the MXU; biases stay f32 (added post-accumulation).
    return (w1.astype(jnp.bfloat16), b1,
            w2.astype(jnp.bfloat16), b2,
            wo.astype(jnp.bfloat16), bo)


# ---------------------------------------------------------------------------
# JointGaussianMixtureModel.forward (non-vision path, uniform prior gating)
# ---------------------------------------------------------------------------
def joint_gmm_forward(states, params):
    """states: (b, t, obs_dim) float32; params: fused params from fuse_params.

    Returns:
      cmp_means  (b, C, t, act_dim)
      cmp_chols  (b, C, t, act_dim, act_dim)  -- diagonal scale_tril
      gating     (b, C, t)                    -- uniform prior 1/C (probs)
    """
    b, t, d = states.shape
    assert d == OBS_DIM
    x_flat = states.reshape(b * t, d)

    means_flat, stds_flat = _run_gmm_mlp(x_flat, params)

    # (b*t, C*A) -> (b, t, C, A) -> (b, C, t, A)
    cmp_means = means_flat.reshape(b, t, NUM_COMPONENTS, ACT_DIM).transpose(0, 2, 1, 3)
    stds = stds_flat.reshape(b, t, NUM_COMPONENTS, ACT_DIM).transpose(0, 2, 1, 3)

    # diag-embed the stds -> diagonal cholesky factors (module returns full A x A)
    eye = jnp.eye(ACT_DIM, dtype=jnp.float32)
    cmp_chols = stds[..., :, None] * eye  # (b, C, t, A, A)

    # uniform prior gating:  repeat(prior, 'c -> b c t')
    prior = jnp.ones((NUM_COMPONENTS,), jnp.float32) / NUM_COMPONENTS
    gating_probs = jnp.broadcast_to(prior[None, :, None], (b, NUM_COMPONENTS, t))

    return cmp_means, cmp_chols, gating_probs


# ---------------------------------------------------------------------------
# Deterministic parameter initialization (synthetic, not a checkpoint load)
# ---------------------------------------------------------------------------
def init_params(key):
    def linear(k, fan_in, fan_out):
        kw, _ = jax.random.split(k)
        scale = 1.0 / math.sqrt(fan_in)
        w = jax.random.uniform(kw, (fan_in, fan_out), jnp.float32, -scale, scale)
        b = jnp.zeros((1, fan_out), jnp.float32)  # biases kept 2-D (1, F) for TPU
        return w, b

    keys = jax.random.split(key, 6)
    w1m, b1m = linear(keys[0], OBS_DIM, HIDDEN)
    w2m, b2m = linear(keys[1], HIDDEN, HIDDEN)
    wom, bom = linear(keys[2], HIDDEN, OUT_DIM)
    w1s, b1s = linear(keys[3], OBS_DIM, HIDDEN)
    w2s, b2s = linear(keys[4], HIDDEN, HIDDEN)
    wos, bos = linear(keys[5], HIDDEN, OUT_DIM)
    return (w1m, b1m, w2m, b2m, wom, bom, w1s, b1s, w2s, b2s, wos, bos)


# Pure-JAX f32 reference of the two MLP heads (for a tolerance check).
def reference_heads(states, raw_params):
    (w1m, b1m, w2m, b2m, wom, bom,
     w1s, b1s, w2s, b2s, wos, bos) = raw_params
    b, t, _ = states.shape
    x = states.reshape(b * t, OBS_DIM)
    hm = jnp.tanh(x @ w1m + b1m)
    hm = jnp.tanh(hm @ w2m + b2m)
    means = hm @ wom + bom
    hs = jnp.tanh(x @ w1s + b1s)
    hs = jnp.tanh(hs @ w2s + b2s)
    stds = jax.nn.softplus(hs @ wos + bos + _INIT_SHIFT) + MINIMAL_STD
    means = means.reshape(b, t, NUM_COMPONENTS, ACT_DIM).transpose(0, 2, 1, 3)
    stds = stds.reshape(b, t, NUM_COMPONENTS, ACT_DIM).transpose(0, 2, 1, 3)
    return means, stds


# TODO(synk): exact internals of get_policy_network (weight init scheme, optional
# shared trunk / transformer variants) are not in the reference; the canonical
# 'bc' + diag + contextual_std MLP parameterization is implemented here.

if __name__ == "__main__":
    key = jax.random.PRNGKey(0)
    pkey, xkey = jax.random.split(key)

    raw_params = init_params(pkey)
    fused = fuse_params(raw_params)

    B, T = 2, 8
    states = jax.random.normal(xkey, (B, T, OBS_DIM), jnp.float32)

    fwd = jax.jit(partial(joint_gmm_forward, params=fused))
    cmp_means, cmp_chols, gating = fwd(states)
    jax.block_until_ready((cmp_means, cmp_chols, gating))

    assert cmp_means.shape == (B, NUM_COMPONENTS, T, ACT_DIM)
    assert cmp_chols.shape == (B, NUM_COMPONENTS, T, ACT_DIM, ACT_DIM)
    assert gating.shape == (B, NUM_COMPONENTS, T)
    assert bool(jnp.all(jnp.isfinite(cmp_means)))
    assert bool(jnp.all(jnp.diagonal(cmp_chols, axis1=-2, axis2=-1) > 0))
    # off-diagonal entries of the diagonal cholesky must be zero
    assert bool(jnp.all((cmp_chols * (1.0 - jnp.eye(ACT_DIM))) == 0.0))
    assert bool(jnp.allclose(gating, 1.0 / NUM_COMPONENTS))

    # bf16-matmul tolerance check against the f32 reference
    ref_means, ref_stds = reference_heads(states, raw_params)
    kernel_stds = jnp.diagonal(cmp_chols, axis1=-2, axis2=-1)
    assert bool(jnp.allclose(cmp_means, ref_means, atol=5e-2, rtol=5e-2))
    assert bool(jnp.allclose(kernel_stds, ref_stds, atol=5e-2, rtol=5e-2))

    print("KERNEL_OK")
</pallas_src>

<mosaic_0001>
module attributes {stable_mosaic.version = 11 : i64} {
  func.func @_gmm_fused_kernel(%arg0: i32, %arg1: memref<16x16xbf16, #tpu.memory_space<vmem>>, %arg2: memref<16x128xbf16, #tpu.memory_space<vmem>>, %arg3: memref<1x128xf32, #tpu.memory_space<vmem>>, %arg4: memref<128x128xbf16, #tpu.memory_space<vmem>>, %arg5: memref<1x128xf32, #tpu.memory_space<vmem>>, %arg6: memref<128x128xbf16, #tpu.memory_space<vmem>>, %arg7: memref<1x128xf32, #tpu.memory_space<vmem>>, %arg8: memref<16x128xf32, #tpu.memory_space<vmem>>) attributes {dimension_semantics = [#tpu.dimension_semantics<parallel>], iteration_bounds = array<i64: 1>, scalar_prefetch = 0 : i64, scratch_operands = 0 : i64, tpu.core_type = #tpu.core_type<tc>, window_params = [{transform_indices = @transform_0, window_bounds = array<i64: 16, 16>}, {pipeline_mode = #tpu.pipeline_mode<synchronous>, transform_indices = @transform_1, window_bounds = array<i64: 16, 128>}, {pipeline_mode = #tpu.pipeline_mode<synchronous>, transform_indices = @transform_2, window_bounds = array<i64: 1, 128>}, {pipeline_mode = #tpu.pipeline_mode<synchronous>, transform_indices = @transform_3, window_bounds = array<i64: 128, 128>}, {pipeline_mode = #tpu.pipeline_mode<synchronous>, transform_indices = @transform_4, window_bounds = array<i64: 1, 128>}, {pipeline_mode = #tpu.pipeline_mode<synchronous>, transform_indices = @transform_5, window_bounds = array<i64: 128, 128>}, {pipeline_mode = #tpu.pipeline_mode<synchronous>, transform_indices = @transform_6, window_bounds = array<i64: 1, 128>}, {transform_indices = @transform_7, window_bounds = array<i64: 16, 128>}]} {
    %c0 = arith.constant 0 : index
    %c0_0 = arith.constant 0 : index
    %0 = vector.load %arg1[%c0, %c0_0] : memref<16x16xbf16, #tpu.memory_space<vmem>>, vector<16x16xbf16>
    %c0_1 = arith.constant 0 : index
    %c0_2 = arith.constant 0 : index
    %1 = vector.load %arg2[%c0_1, %c0_2] : memref<16x128xbf16, #tpu.memory_space<vmem>>, vector<16x128xbf16>
    %cst = arith.constant dense<0.000000e+00> : vector<16x128xf32>
    %2 = tpu.matmul %0, %1, %cst {dimension_numbers = #tpu.dot_dimension_numbers<[1], [0], [0], [1], [0, 0, 1, 1], [], []>} : vector<16x16xbf16>, vector<16x128xbf16>, vector<16x128xf32> -> vector<16x128xf32>
    %c0_3 = arith.constant 0 : index
    %c0_4 = arith.constant 0 : index
    %3 = vector.load %arg3[%c0_3, %c0_4] : memref<1x128xf32, #tpu.memory_space<vmem>>, vector<1x128xf32>
    %4 = vector.broadcast %3 : vector<1x128xf32> to vector<16x128xf32>
    %5 = arith.addf %2, %4 : vector<16x128xf32>
    %6 = math.tanh %5 : vector<16x128xf32>
    %7 = arith.truncf %6 : vector<16x128xf32> to vector<16x128xbf16>
    %c0_5 = arith.constant 0 : index
    %c0_6 = arith.constant 0 : index
    %8 = vector.load %arg4[%c0_5, %c0_6] : memref<128x128xbf16, #tpu.memory_space<vmem>>, vector<128x128xbf16>
    %cst_7 = arith.constant dense<0.000000e+00> : vector<16x128xf32>
    %9 = tpu.matmul %7, %8, %cst_7 {dimension_numbers = #tpu.dot_dimension_numbers<[1], [0], [0], [1], [0, 0, 1, 1], [], []>} : vector<16x128xbf16>, vector<128x128xbf16>, vector<16x128xf32> -> vector<16x128xf32>
    %c0_8 = arith.constant 0 : index
    %c0_9 = arith.constant 0 : index
    %10 = vector.load %arg5[%c0_8, %c0_9] : memref<1x128xf32, #tpu.memory_space<vmem>>, vector<1x128xf32>
    %11 = vector.broadcast %10 : vector<1x128xf32> to vector<16x128xf32>
    %12 = arith.addf %9, %11 : vector<16x128xf32>
    %13 = math.tanh %12 : vector<16x128xf32>
    %14 = arith.truncf %13 : vector<16x128xf32> to vector<16x128xbf16>
    %c0_10 = arith.constant 0 : index
    %c0_11 = arith.constant 0 : index
    %15 = vector.load %arg6[%c0_10, %c0_11] : memref<128x128xbf16, #tpu.memory_space<vmem>>, vector<128x128xbf16>
    %cst_12 = arith.constant dense<0.000000e+00> : vector<16x128xf32>
    %16 = tpu.matmul %14, %15, %cst_12 {dimension_numbers = #tpu.dot_dimension_numbers<[1], [0], [0], [1], [0, 0, 1, 1], [], []>} : vector<16x128xbf16>, vector<128x128xbf16>, vector<16x128xf32> -> vector<16x128xf32>
    %c0_13 = arith.constant 0 : index
    %c0_14 = arith.constant 0 : index
    %17 = vector.load %arg7[%c0_13, %c0_14] : memref<1x128xf32, #tpu.memory_space<vmem>>, vector<1x128xf32>
    %18 = vector.broadcast %17 : vector<1x128xf32> to vector<16x128xf32>
    %19 = arith.addf %16, %18 : vector<16x128xf32>
    %20 = vector.extract_strided_slice %19 {offsets = [0, 16], sizes = [16, 16], strides = [1, 1]} : vector<16x128xf32> to vector<16x16xf32>
    %cst_15 = arith.constant 0.541324854 : f32
    %21 = vector.broadcast %cst_15 : f32 to vector<16x16xf32>
    %22 = arith.addf %20, %21 : vector<16x16xf32>
    %cst_16 = arith.constant 0.000000e+00 : f32
    %23 = vector.broadcast %cst_16 : f32 to vector<16x16xf32>
    %24 = arith.maximumf %22, %23 : vector<16x16xf32>
    %25 = vector.broadcast %cst_16 : f32 to vector<16x16xf32>
    %26 = arith.subf %22, %25 : vector<16x16xf32>
    %27 = arith.cmpf one, %26, %26 : vector<16x16xf32>
    %28 = vector.broadcast %cst_16 : f32 to vector<16x16xf32>
    %29 = arith.addf %22, %28 : vector<16x16xf32>
    %30 = math.absf %26 : vector<16x16xf32>
    %cst_17 = arith.constant 0.000000e+00 : f32
    %31 = vector.broadcast %cst_17 : f32 to vector<16x16xf32>
    %32 = arith.subf %31, %30 : vector<16x16xf32>
    %33 = math.exp %32 : vector<16x16xf32>
    %34 = math.log1p %33 : vector<16x16xf32>
    %35 = arith.addf %24, %34 : vector<16x16xf32>
    %36 = arith.select %27, %29, %35 : vector<16x16xi1>, vector<16x16xf32>
    %cst_18 = arith.constant 9.99999974E-6 : f32
    %37 = vector.broadcast %cst_18 : f32 to vector<16x16xf32>
    %38 = arith.addf %36, %37 : vector<16x16xf32>
    %c0_19 = arith.constant 0 : index
    %c0_20 = arith.constant 0 : index
    %39 = vector.load %arg8[%c0_19, %c0_20] : memref<16x128xf32, #tpu.memory_space<vmem>>, vector<16x128xf32>
    tpu.vector_store %arg8[%c0_19, %c0_20], %19 {strides = array<i32>} : memref<16x128xf32, #tpu.memory_space<vmem>>, vector<16x128xf32>,
    %c0_21 = arith.constant 0 : index
    %c16 = arith.constant 16 : index
    %40 = vector.load %arg8[%c0_21, %c16] : memref<16x128xf32, #tpu.memory_space<vmem>>, vector<16x16xf32>
    tpu.vector_store %arg8[%c0_21, %c16], %38 {strides = array<i32>} : memref<16x128xf32, #tpu.memory_space<vmem>>, vector<16x16xf32>,
    return
  }
  func.func @transform_0(%arg0: i32) -> (i32, i32) {
    %c0_i32 = arith.constant 0 : i32
    %c0_i32_0 = arith.constant 0 : i32
    return %arg0, %c0_i32 : i32, i32
  }
  func.func @transform_1(%arg0: i32) -> (i32, i32) {
    %c0_i32 = arith.constant 0 : i32
    %c0_i32_0 = arith.constant 0 : i32
    %c0_i32_1 = arith.constant 0 : i32
    return %c0_i32, %c0_i32_0 : i32, i32
  }
  func.func @transform_2(%arg0: i32) -> (i32, i32) {
    %c0_i32 = arith.constant 0 : i32
    %c0_i32_0 = arith.constant 0 : i32
    %c0_i32_1 = arith.constant 0 : i32
    return %c0_i32, %c0_i32_0 : i32, i32
  }
  func.func @transform_3(%arg0: i32) -> (i32, i32) {
    %c0_i32 = arith.constant 0 : i32
    %c0_i32_0 = arith.constant 0 : i32
    %c0_i32_1 = arith.constant 0 : i32
    return %c0_i32, %c0_i32_0 : i32, i32
  }
  func.func @transform_4(%arg0: i32) -> (i32, i32) {
    %c0_i32 = arith.constant 0 : i32
    %c0_i32_0 = arith.constant 0 : i32
    %c0_i32_1 = arith.constant 0 : i32
    return %c0_i32, %c0_i32_0 : i32, i32
  }
  func.func @transform_5(%arg0: i32) -> (i32, i32) {
    %c0_i32 = arith.constant 0 : i32
    %c0_i32_0 = arith.constant 0 : i32
    %c0_i32_1 = arith.constant 0 : i32
    return %c0_i32, %c0_i32_0 : i32, i32
  }
  func.func @transform_6(%arg0: i32) -> (i32, i32) {
    %c0_i32 = arith.constant 0 : i32
    %c0_i32_0 = arith.constant 0 : i32
    %c0_i32_1 = arith.constant 0 : i32
    return %c0_i32, %c0_i32_0 : i32, i32
  }
  func.func @transform_7(%arg0: i32) -> (i32, i32) {
    %c0_i32 = arith.constant 0 : i32
    %c0_i32_0 = arith.constant 0 : i32
    return %arg0, %c0_i32 : i32, i32
  }
}

</mosaic_0001>

<bundles_post_ra>
// kernel: joint_gmm_forward.1
= control target key start
LH: loop header
LB: loop body
LE: loop exit
PB: predicated region body
PF: predicated region fallthrough
CT: control target
= control target key end

     0   :  { %12 = vsyncpa [#allocation3], 0  ;;  %s696_s0 = inlined_call_operand.vmem [shape: bf16[16,16], index: 0, kind: input, shape index: {}]   ;;  %s697_s1 = inlined_call_operand.vmem [shape: bf16[16,128], index: 1, kind: input, shape index: {}]   ;;  %s698_s2 = inlined_call_operand.vmem [shape: f32[1,128], index: 2, kind: input, shape index: {}, may-alias: {2,4,6}]   ;;  %s699_s3 = inlined_call_operand.hbm [shape: bf16[128,128], index: 3, kind: input, shape index: {}]   ;;  %s700_s4 = inlined_call_operand.vmem [shape: f32[1,128], index: 4, kind: input, shape index: {}, may-alias: {2,4,6}]   ;;  %s701_s5 = inlined_call_operand.hbm [shape: bf16[128,128], index: 5, kind: input, shape index: {}]   ;;  %s702_s6 = inlined_call_operand.vmem [shape: f32[1,128], index: 6, kind: input, shape index: {}, may-alias: {2,4,6}]   ;;  %s703_s7 = inlined_call_operand.vmem [shape: f32[16,128], index: 7, kind: output, shape index: {}]  }
   0x1   :  { %13 = vsyncpa [#allocation5], 0  ;;  %s579_s24 = smov [#allocation2]   ;;  %s531_s28 = scalar_lea.hbm %s699_s3, 1024 }
   0x2   :  { %s25_s25 = sshll.u32 %s579_s24, 4  ;;  %p532_p0 = scmp.ne.s32.totalorder %s699_s3, %s531_s28  ;;  %s26_s25 = int_to_ptr.vmem [resolvable:$true] %s25_s25 }
   0x3   :  { %p535_p1 = scmp.lt.u32.totalorder %s531_s28, %s699_s3 }
   0x5   :  { %p537_p2 = pnand %p535_p1, %p532_p0 }
   0x7   :  { %540 = shalt.err (!%p537_p2)
}
   0x8   :  { %s541_s10 = scalar_lea.vmem %s26_s25, 1024  ;;  %p546_p4 = scmp.lt.s32.totalorder %s26_s25, %s26_s25 }
   0x9   :  { %p542_p3 = scmp.ne.s32.totalorder %s26_s25, %s541_s10  ;;  %p547_p5 = scmp.lt.s32.totalorder %s541_s10, %s541_s10 }
   0xb   :  { %p548_p6 = por %p547_p5, %p546_p4 }
   0xd   :  { %p549_p7 = pnand %p548_p6, %p542_p3 }
   0xf   :  { %552 = shalt.err (!%p549_p7)
}
  0x10   :  { %s580_s11 = smov 64   ;;  %s581_s12 = smov 4  }
  0x11   :  { %31 = dma.hbm_to_vmem [thread:$0]  %s699_s3, 1024, %s26_s25, [#allocation3], %s580_s11, %s580_s11, %s581_s12  }
  0x12   :  { %s582_s15 = smov [#allocation4]   ;;  %s553_s19 = scalar_lea.hbm %s701_s5, 1024 }
  0x13   :  { %s39_s16 = sshll.u32 %s582_s15, 4  ;;  %p554_p8 = scmp.ne.s32.totalorder %s701_s5, %s553_s19  ;;  %s40_s16 = int_to_ptr.vmem [resolvable:$true] %s39_s16 }
  0x14   :  { %p557_p9 = scmp.lt.u32.totalorder %s553_s19, %s701_s5 }
  0x16   :  { %p559_p10 = pnand %p557_p9, %p554_p8 }
  0x18   :  { %562 = shalt.err (!%p559_p10)
}
  0x19   :  { %s563_s24 = scalar_lea.vmem %s40_s16, 1024  ;;  %p568_p12 = scmp.lt.s32.totalorder %s40_s16, %s40_s16 }
  0x1a   :  { %p564_p11 = scmp.ne.s32.totalorder %s40_s16, %s563_s24  ;;  %p569_p13 = scmp.lt.s32.totalorder %s563_s24, %s563_s24 }
  0x1c   :  { %p570_p0 = por %p569_p13, %p568_p12 }
  0x1e   :  { %p571_p1 = pnand %p570_p0, %p564_p11 }
  0x20   :  { %574 = shalt.err (!%p571_p1)
}
  0x21   :  { %45 = dma.hbm_to_vmem [thread:$0]  %s701_s5, 1024, %s40_s16, [#allocation5], %s580_s11, %s580_s11, %s581_s12  }
  0x22   :  { %575 = dma.done.wait [#allocation3], 1024  }
  0x23   :  { %576 = vsyncadd [#allocation3], 4294966272 }
  0x24   :  { %577 = dma.done.wait [#allocation5], 1024  }
  0x25   :  { %578 = vsyncadd [#allocation5], 4294966272  ;;  %v583_v0 = vmov 0.0   ;;  %vm584_vm0 = vmmov 0   ;;  %v497_v1 = vld [vmem:[%s697_s1] sm:$0xff]   ;;  %vm77_vm1 = vcmask 130048  }
  0x26   :  { %445 = vmatprep.subr.bf16.mxu0 %v583_v0  ;;  %447 = vmatprep.mubr.msk.bf16.mxu0 %vm584_vm0, %v583_v0  ;;  %v498_v2 = vld [vmem:[%s696_s0] sm:$0xff]   ;;  %v500_v4 = vld [vmem:[#allocation2 + $0x8] sm:$0xff]   ;;  %v501_v5 = vld [vmem:[#allocation2 + $0x10] sm:$0xff]   ;;  %vm394_vm5 = vcmask 261248  }
  0x27   :  { %451 = vmatprep.subr.bf16.mxu1 %v583_v0  ;;  %467 = vmatprep.mubr.msk.bf16.mxu1 %vm584_vm0, %v583_v0  ;;  %v499_v3 = vld [vmem:[#allocation2] sm:$0xff]   ;;  %v502_v6 = vld [vmem:[#allocation2 + $0x18] sm:$0xff]   ;;  %v504_v8 = vld [vmem:[#allocation2 + $0x28] sm:$0xff]  }
  0x28   :  { %446 = vmatpush3.bf16.msra.mxu0 %v497_v1  ;;  %452 = vmatpush3.bf16.msra.mxu1 %v499_v3  ;;  %v503_v7 = vld [vmem:[#allocation2 + $0x20] sm:$0xff]   ;;  %v505_v9 = vld [vmem:[#allocation2 + $0x30] sm:$0xff]   ;;  %v506_v10 = vld [vmem:[#allocation2 + $0x38] sm:$0xff]  }
  0x29   :  { %471 = vmatprep.subr.bf16.mxu0 %v583_v0  ;;  %453 = vmatprep.subr.bf16.mxu1 %v583_v0  ;;  %v507_v11 = vld [vmem:[#allocation4] sm:$0xff]   ;;  %v508_v12 = vld [vmem:[#allocation4 + $0x8] sm:$0xff]   ;;  %v509_v13 = vld [vmem:[#allocation4 + $0x10] sm:$0xff]  }
  0x2a   :  { %v510_v14 = vld [vmem:[#allocation4 + $0x18] sm:$0xff]   ;;  %v403_v15 = vld [vmem:[%s698_s2] ss:$0 sm:$0xff]  ;;  %v512_v26 = vld [vmem:[#allocation4 + $0x28] sm:$0xff]  }
  0x2b   :  { %448 = vmatmul.mubr.msk.bf16.vlgmr.msra.gmra.mrb[0].mxu0 %vm77_vm1, %v498_v2  ;;  %v511_v25 = vld [vmem:[#allocation4 + $0x20] sm:$0xff]   ;;  %v513_v27 = vld [vmem:[#allocation4 + $0x30] sm:$0xff]   ;;  %v514_v28 = vld [vmem:[#allocation4 + $0x38] sm:$0xff]  }
  0x2c   :  { %487 = vmatprep.mubr.msk.bf16.mxu0 %vm584_vm0, %v583_v0  ;;  %454 = vmatpush3.bf16.msra.mxu1 %v500_v4  ;;  %v407_v29 = vld [vmem:[%s700_s4] ss:$0 sm:$0xff] }
  0x2d   :  { %455 = vmatprep.subr.bf16.mxu1 %v583_v0  ;;  %472 = vmatpush3.bf16.msra.mxu0 %v507_v11  ;;  %v416_v39 = vld [vmem:[%s702_s6] ss:$0 sm:$0xff] }
  0x2e   :  { %473 = vmatprep.subr.bf16.mxu0 %v583_v0 }
  0x30   :  { %456 = vmatpush3.bf16.msra.mxu1 %v501_v5 }
  0x31   :  { %457 = vmatprep.subr.bf16.mxu1 %v583_v0  ;;  %474 = vmatpush3.bf16.msra.mxu0 %v508_v12 }
  0x32   :  { %475 = vmatprep.subr.bf16.mxu0 %v583_v0 }
  0x34   :  { %458 = vmatpush3.bf16.msra.mxu1 %v502_v6 }
  0x35   :  { %459 = vmatprep.subr.bf16.mxu1 %v583_v0  ;;  %476 = vmatpush3.bf16.msra.mxu0 %v509_v13 }
  0x36   :  { %477 = vmatprep.subr.bf16.mxu0 %v583_v0 }
  0x38   :  { %460 = vmatpush3.bf16.msra.mxu1 %v503_v7 }
  0x39   :  { %461 = vmatprep.subr.bf16.mxu1 %v583_v0  ;;  %478 = vmatpush3.bf16.msra.mxu0 %v510_v14 }
  0x3a   :  { %479 = vmatprep.subr.bf16.mxu0 %v583_v0 }
  0x3c   :  { %462 = vmatpush3.bf16.msra.mxu1 %v504_v8 }
  0x3d   :  { %463 = vmatprep.subr.bf16.mxu1 %v583_v0  ;;  %480 = vmatpush3.bf16.msra.mxu0 %v511_v25 }
  0x3e   :  { %481 = vmatprep.subr.bf16.mxu0 %v583_v0 }
  0x40   :  { %464 = vmatpush3.bf16.msra.mxu1 %v505_v9 }
  0x41   :  { %465 = vmatprep.subr.bf16.mxu1 %v583_v0  ;;  %482 = vmatpush3.bf16.msra.mxu0 %v512_v26 }
  0x42   :  { %483 = vmatprep.subr.bf16.mxu0 %v583_v0 }
  0x44   :  { %466 = vmatpush3.bf16.msra.mxu1 %v506_v10 }
  0x45   :  { %484 = vmatpush3.bf16.msra.mxu0 %v513_v27 }
  0x46   :  { %485 = vmatprep.subr.bf16.mxu0 %v583_v0 }
  0x49   :  { %486 = vmatpush3.bf16.msra.mxu0 %v514_v28 }
  0xfe   :  { %v115_v16 = vpop.f32.mrb[0].mxu0 }
  0xff   :  { %v116_v17 = vadd.f32 %v403_v15, %v115_v16  ;;  %v449_v18 = vpop.f32.mrb[1].mxu0 }
 0x100   :  { %v118_v19 = vpop.f32.mrb[2].mxu0 }
 0x101   :  { %v119_v20 = vadd.f32 %v403_v15, %v118_v19  ;;  %v450_v21 = vpop.f32.mrb[3].mxu0  ;;  %515 = vtanh.f32 %v116_v17 }
 0x103   :  { %517 = vtanh.f32 %v119_v20 }
 0x10b   :  { %v516_v22 = vpop.eup %515 }
 0x10d   :  { %v518_v23 = vpop.eup %517 }
 0x10e   :  { %v124_v24 = vpack.c.bf16 %v518_v23, %v516_v22 }
 0x110   :  { %468 = vmatmul.mubr.bf16.vlgmr.msra.gmra.mrb[0].mxu1 %v124_v24 }
 0x1e3   :  { %v230_v30 = vpop.f32.mrb[0].mxu1 }
 0x1e4   :  { %v231_v31 = vadd.f32 %v407_v29, %v230_v30  ;;  %v469_v32 = vpop.f32.mrb[1].mxu1 }
 0x1e5   :  { %v233_v33 = vpop.f32.mrb[2].mxu1 }
 0x1e6   :  { %v234_v34 = vadd.f32 %v407_v29, %v233_v33  ;;  %v470_v35 = vpop.f32.mrb[3].mxu1  ;;  %519 = vtanh.f32 %v231_v31 }
 0x1e8   :  { %521 = vtanh.f32 %v234_v34 }
 0x1f0   :  { %v520_v36 = vpop.eup %519 }
 0x1f2   :  { %v522_v37 = vpop.eup %521 }
 0x1f3   :  { %v239_v38 = vpack.c.bf16 %v522_v37, %v520_v36 }
 0x1f5   :  { %488 = vmatmul.mubr.bf16.vlgmr.msra.gmra.mrb[4].mxu0 %v239_v38 }
 0x2c8   :  { %v345_v40 = vpop.f32.mrb[4].mxu0 }
 0x2c9   :  { %v346_v41 = vadd.f32 %v416_v39, %v345_v40  ;;  %v489_v42 = vpop.f32.mrb[5].mxu0 }
 0x2ca   :  { %v348_v43 = vpop.f32.mrb[6].mxu0 }
 0x2cb   :  { %v352_v44 = vadd.f32 0.54132485, %v346_v41  ;;  %392 = vst [vmem:[%s703_s7] sm:$0xff] %v346_v41  ;;  %v349_v45 = vadd.f32 %v416_v39, %v348_v43  ;;  %v490_v46 = vpop.f32.mrb[7].mxu0 }
 0x2cd   :  { %v360_v47 = vand.u32 2147483647, %v352_v44  ;;  %v353_v48 = vadd.f32 0.54132485, %v349_v45  ;;  %393 = vst [vmem:[%s703_s7 + $0x8] sm:$0xff] %v349_v45  ;;  %v354_v4 = vmax.f32 %v352_v44, 0.0  ;;  %vm356_vm4 = vcmp.ne.f32.partialorder %v352_v44, %v352_v44 }
 0x2cf   :  { %v362_v49 = vsub.f32 0.0, %v360_v47  ;;  %v361_v50 = vand.u32 2147483647, %v353_v48  ;;  %v355_v9 = vmax.f32 %v353_v48, 0.0  ;;  %vm357_vm6 = vcmp.ne.f32.partialorder %v353_v48, %v353_v48 }
 0x2d1   :  { %v364_v51 = vmul.f32 1.442695, %v362_v49  ;;  %v363_v52 = vsub.f32 0.0, %v361_v50 }
 0x2d3   :  { %523 = vpow2.f32 %v364_v51  ;;  %v366_v53 = vmul.f32 1.442695, %v363_v52 }
 0x2d5   :  { %525 = vpow2.f32 %v366_v53 }
 0x2dd   :  { %v524_v54 = vpop.eup %523 }
 0x2de   :  { %v368_v55 = vadd.f32 1.0, %v524_v54  ;;  %v371_v58 = vmul.f32 -0.5, %v524_v54  ;;  %v374_v61 = vand.u32 2147483647, %v524_v54 }
 0x2df   :  { %v526_v56 = vpop.eup %525 }
 0x2e0   :  { %527 = vlog2.f32 %v368_v55  ;;  %v377_v57 = vadd.f32 1.0, %v526_v56  ;;  %v380_v59 = vmul.f32 -0.5, %v526_v56  ;;  %v372_v60 = vadd.f32 1.0, %v371_v58 }
 0x2e1   :  { %v383_v0 = vand.u32 2147483647, %v526_v56  ;;  %vm375_vm2 = vcmp.lt.f32.partialorder %v374_v61, 0.0004427343 }
 0x2e2   :  { %529 = vlog2.f32 %v377_v57  ;;  %v381_v62 = vadd.f32 1.0, %v380_v59  ;;  %v373_v2 = vmul.f32 %v524_v54, %v372_v60 }
 0x2e3   :  { %vm384_vm3 = vcmp.lt.f32.partialorder %v383_v0, 0.0004427343 }
 0x2e4   :  { %v382_v7 = vmul.f32 %v526_v56, %v381_v62 }
 0x2ea   :  { %v528_v63 = vpop.eup %527 }
 0x2eb   :  { %v370_v1 = vmul.f32 0.6931472, %v528_v63 }
 0x2ec   :  { %v530_v3 = vpop.eup %529 }
 0x2ed   :  { %v376_v5 = vsel %vm375_vm2, %v373_v2, %v370_v1  ;;  %v379_v6 = vmul.f32 0.6931472, %v530_v3 }
 0x2ee   :  { %v386_v8 = vadd.f32 %v376_v5, %v354_v4 }
 0x2ef   :  { %v385_v10 = vsel %vm384_vm3, %v382_v7, %v379_v6 }
 0x2f0   :  { %v388_v11 = vsel %vm356_vm4, %v352_v44, %v386_v8  ;;  %v387_v12 = vadd.f32 %v385_v10, %v355_v9 }
 0x2f1   :  { %v390_v13 = vadd.f32 1e-05, %v388_v11 }
 0x2f2   :  { %v389_v14 = vsel %vm357_vm6, %v353_v48, %v387_v12 }
 0x2f3   :  { %395 = vst.msk [vmem:[%s703_s7] sm:$0xff] %vm394_vm5, %v390_v13  ;;  %v391_v15 = vadd.f32 1e-05, %v389_v14 }
 0x2f5   :  { %396 = vst.msk [vmem:[%s703_s7 + $0x8] sm:$0xff] %vm394_vm5, %v391_v15 }
 0x2f6   :  { %401 = vsyncpa [#allocation3], 1 }
 0x2f7   :  { %402 = vsyncpa [#allocation5], 1 }

</bundles_post_ra>
